<compile_context>
chip_gen: v7x
topology: tpu7x:2x2x1
jax: 0.10.0
libtpu: 0.0.40
codegen_flags: <defaults>
</compile_context>

<pallas_src>
import jax
import jax.numpy as jnp
from jax.experimental import pallas as pl
from jax.experimental.pallas import tpu as pltpu


def _packed_linear_kernel(x_ref, w_ref, o_ref):
    # x_ref: [TMp, P*c_in]   w_ref: [P*c_in, P*d_model]   o_ref: [TMp, P*d_model]
    o_ref[...] = jnp.dot(
        x_ref[...], w_ref[...], preferred_element_type=jnp.float32
    ).astype(o_ref.dtype)


def _build_block_diag_weight(weight, pack):
    """weight: [d_model, c_in] (PyTorch nn.Linear layout).

    Returns a [pack*c_in, pack*d_model] block-diagonal matrix holding `pack` copies of W^T;
    the transpose is folded into the einsum (no standalone weight.T in the hot path).
    Cheap (<= ~4 MiB) and built once per call outside the kernel.
    """
    d_model, c_in = weight.shape
    eye = jnp.eye(pack, dtype=weight.dtype)
    wb = jnp.einsum("pq,da->paqd", eye, weight)          # [P, c_in, P, d_model]
    return wb.reshape(pack * c_in, pack * d_model)


def _round_up(v, m):
    return ((v + m - 1) // m) * m


def _auto_pack(c_in, d_model, itemsize):
    """Pick the pack factor.

    Lane-dense input (P*c_in == 128) where possible; capped at 32 on v5e (f32 multi-pass MXU
    plus Px redundant FLOPs would flip the kernel MXU-bound at P=64); capped so the
    block-diagonal weight stays <= ~4 MiB of VMEM.
    """
    p = max(1, 128 // max(c_in, 1))
    try:
        kind = jax.devices()[0].device_kind.lower()
    except Exception:
        kind = ""
    if "v5" in kind:
        p = min(p, 32)
    while p > 1 and (p * c_in) * (p * d_model) * itemsize > 4 * 1024 * 1024:
        p //= 2
    return p


def edge_data_embedding(x, weight, *, pack=None, target_out_tile_bytes=8 * 1024 * 1024):
    """
    x:      [B, N, edge_feats]      (float32)
    weight: [d_model, edge_feats]   (PyTorch nn.Linear weight layout)
    returns [B, N, d_model]
    """
    B, N, c_in = x.shape
    d_model = weight.shape[0]
    itemsize = jnp.dtype(x.dtype).itemsize
    M = B * N

    P = pack if pack is not None else _auto_pack(c_in, d_model, itemsize)

    # Pad only to a multiple of P (<= P-1 extra rows). Partial grid blocks are masked by
    # Pallas, so there is no padding to tile granularity and (when M % P == 0) no output slice.
    Mp = pl.cdiv(M, P)                      # number of packed rows
    M_pad = Mp * P

    x2d = x.reshape(M, c_in)                # free row-major reshape
    if M_pad != M:
        x2d = jnp.pad(x2d, ((0, M_pad - M), (0, 0)))   # tiny pad; zero rows -> zero outputs
    x_packed = x2d.reshape(Mp, P * c_in)    # free row-major reshape (128 lanes at P=64, c_in=2)

    w_block = _build_block_diag_weight(weight, P)       # [P*c_in, P*d_model]

    # Tile geometry: ~8 MiB of output per grid step (HBM-write bound kernel), clamped to the
    # actual packed-row count, sublane-aligned.
    row_out_bytes = P * d_model * itemsize
    TMp = max(8, (target_out_tile_bytes // row_out_bytes) // 8 * 8)
    TMp = min(TMp, _round_up(Mp, 8))
    # v7x has 2 TensorCores; keep at least 2 parallel grid steps unless M is genuinely tiny.
    if pl.cdiv(Mp, TMp) == 1 and Mp > 16:
        TMp = max(8, _round_up(pl.cdiv(Mp, 2), 8))

    grid = (pl.cdiv(Mp, TMp),)
    out_packed = pl.pallas_call(
        _packed_linear_kernel,
        out_shape=jax.ShapeDtypeStruct((Mp, P * d_model), x.dtype),
        grid=grid,
        in_specs=[
            pl.BlockSpec((TMp, P * c_in), lambda i: (i, 0)),            # tiled over packed rows
            pl.BlockSpec((P * c_in, P * d_model), lambda i: (0, 0)),    # weight resident
        ],
        out_specs=pl.BlockSpec((TMp, P * d_model), lambda i: (i, 0)),   # lane-dense, ~8 MiB/step
        compiler_params=pltpu.CompilerParams(
            dimension_semantics=("parallel",),          # shard grid across TensorCores (v7x)
            vmem_limit_bytes=48 * 1024 * 1024,          # < v7x 64 MiB phys; > v5e 16 MiB default
        ),
    )(x_packed, w_block)

    # Packed row-major layout == original [M_pad, d_model] layout: reshape is free.
    out2d = out_packed.reshape(M_pad, d_model)
    if M_pad != M:
        out2d = out2d[:M]                   # only when B*N is not a multiple of P (< P rows)
    return out2d.reshape(B, N, d_model)


if __name__ == "__main__":
    # Small shapes consistent with the module: edge_feats=2, d_model=32.
    B, N, edge_feats, d_model = 2, 8, 2, 32

    key = jax.random.PRNGKey(0)
    kx, kw, kx2, kx3 = jax.random.split(key, 4)

    x = jax.random.normal(kx, (B, N, edge_feats), dtype=jnp.float32)

    # Deterministic init matching nn.Linear default: U(-1/sqrt(c_in), 1/sqrt(c_in)).
    bound = 1.0 / jnp.sqrt(jnp.float32(edge_feats))
    weight = jax.random.uniform(
        kw, (d_model, edge_feats), dtype=jnp.float32, minval=-bound, maxval=bound
    )

    out = jax.block_until_ready(edge_data_embedding(x, weight))
    ref = x @ weight.T
    assert out.shape == (B, N, d_model)
    assert jnp.allclose(out, ref, atol=1e-5, rtol=1e-5)

    # Ragged token count (B*N not a multiple of the pack factor).
    B2, N2 = 3, 37
    x2 = jax.random.normal(kx2, (B2, N2, edge_feats), dtype=jnp.float32)
    out2 = jax.block_until_ready(edge_data_embedding(x2, weight))
    ref2 = x2 @ weight.T
    assert out2.shape == (B2, N2, d_model)
    assert jnp.allclose(out2, ref2, atol=1e-5, rtol=1e-5)

    # Multi-step parallel grid with a partial (masked) last block.
    B3, N3 = 4, 600
    x3 = jax.random.normal(kx3, (B3, N3, edge_feats), dtype=jnp.float32)
    out3 = jax.block_until_ready(edge_data_embedding(x3, weight))
    ref3 = x3 @ weight.T
    assert out3.shape == (B3, N3, d_model)
    assert jnp.allclose(out3, ref3, atol=1e-5, rtol=1e-5)

    print("KERNEL_OK")
</pallas_src>

<mosaic_0001>
module attributes {stable_mosaic.version = 11 : i64} {
  func.func @_packed_linear_kernel(%arg0: i32, %arg1: memref<8x128xf32, #tpu.memory_space<vmem>>, %arg2: memref<128x2048xf32, #tpu.memory_space<vmem>>, %arg3: memref<8x2048xf32, #tpu.memory_space<vmem>>) attributes {dimension_semantics = [#tpu.dimension_semantics<parallel>], iteration_bounds = array<i64: 1>, scalar_prefetch = 0 : i64, scratch_operands = 0 : i64, tpu.core_type = #tpu.core_type<tc>, window_params = [{transform_indices = @transform_0, window_bounds = array<i64: 8, 128>}, {pipeline_mode = #tpu.pipeline_mode<synchronous>, transform_indices = @transform_1, window_bounds = array<i64: 128, 2048>}, {transform_indices = @transform_2, window_bounds = array<i64: 8, 2048>}]} {
    %c0 = arith.constant 0 : index
    %c0_0 = arith.constant 0 : index
    %0 = vector.load %arg1[%c0, %c0_0] : memref<8x128xf32, #tpu.memory_space<vmem>>, vector<8x128xf32>
    %c0_1 = arith.constant 0 : index
    %c0_2 = arith.constant 0 : index
    %1 = vector.load %arg2[%c0_1, %c0_2] : memref<128x2048xf32, #tpu.memory_space<vmem>>, vector<128x2048xf32>
    %cst = arith.constant dense<0.000000e+00> : vector<8x2048xf32>
    %2 = tpu.matmul %0, %1, %cst {dimension_numbers = #tpu.dot_dimension_numbers<[1], [0], [0], [1], [0, 0, 1, 1], [], []>} : vector<8x128xf32>, vector<128x2048xf32>, vector<8x2048xf32> -> vector<8x2048xf32>
    %c0_3 = arith.constant 0 : index
    %c0_4 = arith.constant 0 : index
    %3 = vector.load %arg3[%c0_3, %c0_4] : memref<8x2048xf32, #tpu.memory_space<vmem>>, vector<8x2048xf32>
    tpu.vector_store %arg3[%c0_3, %c0_4], %2 {strides = array<i32>} : memref<8x2048xf32, #tpu.memory_space<vmem>>, vector<8x2048xf32>,
    return
  }
  func.func @transform_0(%arg0: i32) -> (i32, i32) {
    %c0_i32 = arith.constant 0 : i32
    %c0_i32_0 = arith.constant 0 : i32
    return %arg0, %c0_i32 : i32, i32
  }
  func.func @transform_1(%arg0: i32) -> (i32, i32) {
    %c0_i32 = arith.constant 0 : i32
    %c0_i32_0 = arith.constant 0 : i32
    %c0_i32_1 = arith.constant 0 : i32
    return %c0_i32, %c0_i32_0 : i32, i32
  }
  func.func @transform_2(%arg0: i32) -> (i32, i32) {
    %c0_i32 = arith.constant 0 : i32
    %c0_i32_0 = arith.constant 0 : i32
    return %arg0, %c0_i32 : i32, i32
  }
}

</mosaic_0001>

<bundles_post_ra>
// kernel: tpu_custom_call.1
= control target key start
LH: loop header
LB: loop body
LE: loop exit
PB: predicated region body
PF: predicated region fallthrough
CT: control target
= control target key end

     0   :  { %7 = vsyncpa [#allocation3], 0  ;;  %s1657_s0 = inlined_call_operand.hbm [shape: f32[1,128], index: 0, kind: input, shape index: {}]   ;;  %s1658_s1 = inlined_call_operand.hbm [shape: f32[128,2048], index: 1, kind: input, shape index: {}]   ;;  %s1659_s2 = inlined_call_operand.hbm [shape: f32[1,2048], index: 2, kind: output, shape index: {}]  }
   0x1   :  { %8 = vsyncpa [#allocation6], 0 }
   0x2   :  { %9 = vsyncpa [#allocation4], 0 }
   0x3   :  { %14 = vsyncadd [#allocation3], 112  ;;  %s1541_s9 = smov [#allocation2]   ;;  %s1469_s13 = scalar_lea.hbm %s1657_s0, 16 }
   0x4   :  { %s15_s10 = sshll.u32 %s1541_s9, 4  ;;  %p1470_p0 = scmp.ne.s32.totalorder %s1657_s0, %s1469_s13  ;;  %s16_s10 = int_to_ptr.vmem [resolvable:$true] %s15_s10 }
   0x5   :  { %p1473_p1 = scmp.lt.u32.totalorder %s1469_s13, %s1657_s0 }
   0x7   :  { %p1475_p2 = pnand %p1473_p1, %p1470_p0 }
   0x9   :  { %1478 = shalt.err (!%p1475_p2)
}
   0xa   :  { %s1479_s18 = scalar_lea.vmem %s16_s10, 16  ;;  %s1483_s19 = scalar_lea.vmem %s16_s10, 128 }
   0xb   :  { %p1480_p3 = scmp.ne.s32.totalorder %s16_s10, %s1479_s18  ;;  %p1484_p4 = scmp.lt.s32.totalorder %s16_s10, %s16_s10 }
   0xc   :  { %p1485_p5 = scmp.lt.s32.totalorder %s1483_s19, %s1479_s18 }
   0xe   :  { %p1486_p6 = por %p1485_p5, %p1484_p4 }
  0x10   :  { %p1487_p7 = pnand %p1486_p6, %p1480_p3 }
  0x12   :  { %1490 = shalt.err (!%p1487_p7)
}
  0x13   :  { %s1542_s20 = smov 16   ;;  %s1543_s21 = smov 1  }
  0x14   :  { %21 = dma.hbm_to_vmem [thread:$0]  %s1657_s0, 16, %s16_s10, [#allocation3], %s1542_s20, %s1542_s20, %s1543_s21  }
  0x15   :  { %s1544_s24 = smov [#allocation5]   ;;  %s1491_s28 = scalar_lea.hbm %s1658_s1, 32768 }
  0x16   :  { %s27_s25 = sshll.u32 %s1544_s24, 4  ;;  %p1492_p8 = scmp.ne.s32.totalorder %s1658_s1, %s1491_s28  ;;  %s28_s25 = int_to_ptr.vmem [resolvable:$true] %s27_s25 }
  0x17   :  { %p1495_p9 = scmp.lt.u32.totalorder %s1491_s28, %s1658_s1 }
  0x19   :  { %p1497_p10 = pnand %p1495_p9, %p1492_p8 }
  0x1b   :  { %1500 = shalt.err (!%p1497_p10)
}
  0x1c   :  { %s1501_s5 = scalar_lea.vmem %s28_s25, 32768  ;;  %p1506_p12 = scmp.lt.s32.totalorder %s28_s25, %s28_s25 }
  0x1d   :  { %p1502_p11 = scmp.ne.s32.totalorder %s28_s25, %s1501_s5  ;;  %p1507_p13 = scmp.lt.s32.totalorder %s1501_s5, %s1501_s5 }
  0x1f   :  { %p1508_p0 = por %p1507_p13, %p1506_p12 }
  0x21   :  { %p1509_p1 = pnand %p1508_p0, %p1502_p11 }
  0x23   :  { %1512 = shalt.err (!%p1509_p1)
}
  0x24   :  { %s1545_s0 = smov 2048   ;;  %s1546_s6 = smov 128  }
  0x25   :  { %33 = dma.hbm_to_vmem [thread:$0]  %s1658_s1, 32768, %s28_s25, [#allocation6], %s1545_s0, %s1545_s0, %s1546_s6  }
  0x26   :  { %1535 = dma.done.wait [#allocation3], 128  }
  0x27   :  { %1536 = vsyncadd [#allocation3], 4294967168 }
  0x28   :  { %1537 = dma.done.wait [#allocation6], 32768  }
  0x29   :  { %1538 = vsyncadd [#allocation6], 4294934528  ;;  %v1547_v0 = vmov 0.0   ;;  %v42_v1 = vld [vmem:[#allocation5 + $0x8] sm:$0xff]  ;;  %v44_v3 = vld [vmem:[#allocation5 + $0x18] sm:$0xff] }
  0x2a   :  { %361 = vmatprep.mubr.f32.mxu0 %v1547_v0  ;;  %432 = vmatprep.mubr.f32.mxu1 %v1547_v0  ;;  %v58_v2 = vld [vmem:[#allocation5 + $0x88] sm:$0xff]  ;;  %v60_v5 = vld [vmem:[#allocation5 + $0x98] sm:$0xff]  ;;  %v41_v6 = vld [vmem:[#allocation5] sm:$0xff] }
  0x2b   :  { %v1203_v4 = vpack.c.bf16 %v58_v2, %v42_v1  ;;  %v57_v7 = vld [vmem:[#allocation5 + $0x80] sm:$0xff]  ;;  %v1235_v8 = vpack.c.bf16 %v60_v5, %v44_v3  ;;  %v43_v10 = vld [vmem:[#allocation5 + $0x10] sm:$0xff]  ;;  %v74_v12 = vld [vmem:[#allocation5 + $0x108] sm:$0xff] }
  0x2c   :  { %v1205_v9 = vpack.c.bf16 %v57_v7, %v41_v6  ;;  %v59_v11 = vld [vmem:[#allocation5 + $0x90] sm:$0xff]  ;;  %v90_v14 = vld [vmem:[#allocation5 + $0x188] sm:$0xff]  ;;  %v76_v15 = vld [vmem:[#allocation5 + $0x118] sm:$0xff] }
  0x2d   :  { %1204 = vmatprep.subr.bf16.mxu0 %v1203_v4  ;;  %v1237_v13 = vpack.c.bf16 %v59_v11, %v43_v10  ;;  %v92_v16 = vld [vmem:[#allocation5 + $0x198] sm:$0xff]  ;;  %1236 = vmatprep.subr.bf16.mxu1 %v1235_v8  ;;  %v1207_v17 = vpack.c.bf16 %v90_v14, %v74_v12  ;;  %v73_v19 = vld [vmem:[#allocation5 + $0x100] sm:$0xff]  ;;  %v75_v21 = vld [vmem:[#allocation5 + $0x110] sm:$0xff] }
  0x2e   :  { %1206 = vmatpush1.bf16.msra.mxu0 %v1205_v9  ;;  %v1239_v18 = vpack.c.bf16 %v92_v16, %v76_v15  ;;  %v89_v20 = vld [vmem:[#allocation5 + $0x180] sm:$0xff]  ;;  %v91_v23 = vld [vmem:[#allocation5 + $0x190] sm:$0xff]  ;;  %v106_v24 = vld [vmem:[#allocation5 + $0x208] sm:$0xff] }
  0x2f   :  { %1238 = vmatpush1.bf16.msra.mxu1 %v1237_v13  ;;  %v1209_v22 = vpack.c.bf16 %v89_v20, %v73_v19  ;;  %v122_v25 = vld [vmem:[#allocation5 + $0x288] sm:$0xff]  ;;  %1208 = vmatprep.subr.bf16.mxu0 %v1207_v17  ;;  %v1241_v26 = vpack.c.bf16 %v91_v23, %v75_v21  ;;  %v108_v28 = vld [vmem:[#allocation5 + $0x218] sm:$0xff]  ;;  %v105_v30 = vld [vmem:[#allocation5 + $0x200] sm:$0xff] }
  0x30   :  { %1240 = vmatprep.subr.bf16.mxu1 %v1239_v18  ;;  %v1211_v27 = vpack.c.bf16 %v122_v25, %v106_v24  ;;  %v124_v29 = vld [vmem:[#allocation5 + $0x298] sm:$0xff]  ;;  %v121_v32 = vld [vmem:[#allocation5 + $0x280] sm:$0xff]  ;;  %v107_v33 = vld [vmem:[#allocation5 + $0x210] sm:$0xff] }
  0x31   :  { %v1243_v31 = vpack.c.bf16 %v124_v29, %v108_v28  ;;  %v123_v34 = vld [vmem:[#allocation5 + $0x290] sm:$0xff]  ;;  %v1213_v35 = vpack.c.bf16 %v121_v32, %v105_v30  ;;  %v138_v36 = vld [vmem:[#allocation5 + $0x308] sm:$0xff]  ;;  %v140_v38 = vld [vmem:[#allocation5 + $0x318] sm:$0xff] }
  0x32   :  { %1210 = vmatpush1.bf16.msra.mxu0 %v1209_v22  ;;  %v154_v37 = vld [vmem:[#allocation5 + $0x388] sm:$0xff]  ;;  %v1245_v39 = vpack.c.bf16 %v123_v34, %v107_v33  ;;  %v156_v41 = vld [vmem:[#allocation5 + $0x398] sm:$0xff]  ;;  %v137_v42 = vld [vmem:[#allocation5 + $0x300] sm:$0xff] }
  0x33   :  { %1242 = vmatpush1.bf16.msra.mxu1 %v1241_v26  ;;  %1212 = vmatprep.subr.bf16.mxu0 %v1211_v27  ;;  %v1215_v40 = vpack.c.bf16 %v154_v37, %v138_v36  ;;  %v153_v43 = vld [vmem:[#allocation5 + $0x380] sm:$0xff]  ;;  %v1247_v44 = vpack.c.bf16 %v156_v41, %v140_v38  ;;  %v139_v45 = vld [vmem:[#allocation5 + $0x310] sm:$0xff]  ;;  %v170_v47 = vld [vmem:[#allocation5 + $0x408] sm:$0xff] }
  0x34   :  { %1244 = vmatprep.subr.bf16.mxu1 %v1243_v31  ;;  %v155_v46 = vld [vmem:[#allocation5 + $0x390] sm:$0xff]  ;;  %v186_v48 = vld [vmem:[#allocation5 + $0x488] sm:$0xff]  ;;  %v172_v49 = vld [vmem:[#allocation5 + $0x418] sm:$0xff]  ;;  %v1217_v51 = vpack.c.bf16 %v153_v43, %v137_v42 }
  0x35   :  { %v188_v50 = vld [vmem:[#allocation5 + $0x498] sm:$0xff]  ;;  %v1249_v52 = vpack.c.bf16 %v155_v46, %v139_v45  ;;  %v1219_v53 = vpack.c.bf16 %v186_v48, %v170_v47  ;;  %v169_v54 = vld [vmem:[#allocation5 + $0x400] sm:$0xff]  ;;  %v171_v56 = vld [vmem:[#allocation5 + $0x410] sm:$0xff] }
  0x36   :  { %1214 = vmatpush1.bf16.msra.mxu0 %v1213_v35  ;;  %v185_v55 = vld [vmem:[#allocation5 + $0x480] sm:$0xff]  ;;  %v1251_v57 = vpack.c.bf16 %v188_v50, %v172_v49  ;;  %v187_v58 = vld [vmem:[#allocation5 + $0x490] sm:$0xff]  ;;  %v202_v59 = vld [vmem:[#allocation5 + $0x508] sm:$0xff] }
  0x37   :  { %1246 = vmatpush1.bf16.msra.mxu1 %v1245_v39  ;;  %1216 = vmatprep.subr.bf16.mxu0 %v1215_v40  ;;  %v218_v60 = vld [vmem:[#allocation5 + $0x588] sm:$0xff]  ;;  %v204_v61 = vld [vmem:[#allocation5 + $0x518] sm:$0xff]  ;;  %v1221_v63 = vpack.c.bf16 %v185_v55, %v169_v54  ;;  %v1253_v1 = vpack.c.bf16 %v187_v58, %v171_v56  ;;  %v201_v3 = vld [vmem:[#allocation5 + $0x500] sm:$0xff] }
  0x38   :  { %1248 = vmatprep.subr.bf16.mxu1 %v1247_v44  ;;  %v220_v62 = vld [vmem:[#allocation5 + $0x598] sm:$0xff]  ;;  %v1223_v2 = vpack.c.bf16 %v218_v60, %v202_v59  ;;  %v217_v4 = vld [vmem:[#allocation5 + $0x580] sm:$0xff]  ;;  %v203_v5 = vld [vmem:[#allocation5 + $0x510] sm:$0xff] }
  0x39   :  { %v1255_v6 = vpack.c.bf16 %v220_v62, %v204_v61  ;;  %v219_v7 = vld [vmem:[#allocation5 + $0x590] sm:$0xff]  ;;  %v234_v8 = vld [vmem:[#allocation5 + $0x608] sm:$0xff]  ;;  %v236_v10 = vld [vmem:[#allocation5 + $0x618] sm:$0xff]  ;;  %v1225_v12 = vpack.c.bf16 %v217_v4, %v201_v3 }
  0x3a   :  { %1218 = vmatpush1.bf16.msra.mxu0 %v1217_v51  ;;  %v250_v9 = vld [vmem:[#allocation5 + $0x688] sm:$0xff]  ;;  %v252_v11 = vld [vmem:[#allocation5 + $0x698] sm:$0xff]  ;;  %v1257_v13 = vpack.c.bf16 %v219_v7, %v203_v5  ;;  %v233_v15 = vld [vmem:[#allocation5 + $0x600] sm:$0xff] }
  0x3b   :  { %1250 = vmatpush1.bf16.msra.mxu1 %v1249_v52  ;;  %1220 = vmatprep.subr.bf16.mxu0 %v1219_v53  ;;  %v1227_v14 = vpack.c.bf16 %v250_v9, %v234_v8  ;;  %v249_v16 = vld [vmem:[#allocation5 + $0x680] sm:$0xff]  ;;  %v235_v17 = vld [vmem:[#allocation5 + $0x610] sm:$0xff]  ;;  %v1259_v18 = vpack.c.bf16 %v252_v11, %v236_v10  ;;  %v266_v20 = vld [vmem:[#allocation5 + $0x708] sm:$0xff] }
  0x3c   :  { %1252 = vmatprep.subr.bf16.mxu1 %v1251_v57  ;;  %v251_v19 = vld [vmem:[#allocation5 + $0x690] sm:$0xff]  ;;  %v282_v21 = vld [vmem:[#allocation5 + $0x788] sm:$0xff]  ;;  %v268_v22 = vld [vmem:[#allocation5 + $0x718] sm:$0xff]  ;;  %v1229_v24 = vpack.c.bf16 %v249_v16, %v233_v15 }
  0x3d   :  { %v284_v23 = vld [vmem:[#allocation5 + $0x798] sm:$0xff]  ;;  %v1261_v25 = vpack.c.bf16 %v251_v19, %v235_v17  ;;  %v1231_v26 = vpack.c.bf16 %v282_v21, %v266_v20  ;;  %v265_v27 = vld [vmem:[#allocation5 + $0x700] sm:$0xff]  ;;  %v267_v29 = vld [vmem:[#allocation5 + $0x710] sm:$0xff] }
  0x3e   :  { %1222 = vmatpush1.bf16.msra.mxu0 %v1221_v63  ;;  %v281_v28 = vld [vmem:[#allocation5 + $0x780] sm:$0xff]  ;;  %v1263_v30 = vpack.c.bf16 %v284_v23, %v268_v22  ;;  %v283_v31 = vld [vmem:[#allocation5 + $0x790] sm:$0xff]  ;;  %v46_v32 = vld [vmem:[#allocation5 + $0x28] sm:$0xff] }
  0x3f   :  { %1254 = vmatpush1.bf16.msra.mxu1 %v1253_v1  ;;  %1224 = vmatprep.subr.bf16.mxu0 %v1223_v2  ;;  %v62_v33 = vld [vmem:[#allocation5 + $0xa8] sm:$0xff]  ;;  %v48_v34 = vld [vmem:[#allocation5 + $0x38] sm:$0xff]  ;;  %v1233_v36 = vpack.c.bf16 %v281_v28, %v265_v27  ;;  %v1265_v37 = vpack.c.bf16 %v283_v31, %v267_v29  ;;  %v45_v39 = vld [vmem:[#allocation5 + $0x20] sm:$0xff] }
  0x40   :  { %1256 = vmatprep.subr.bf16.mxu1 %v1255_v6  ;;  %v64_v35 = vld [vmem:[#allocation5 + $0xb8] sm:$0xff]  ;;  %v1267_v38 = vpack.c.bf16 %v62_v33, %v46_v32  ;;  %v61_v40 = vld [vmem:[#allocation5 + $0xa0] sm:$0xff]  ;;  %v47_v41 = vld [vmem:[#allocation5 + $0x30] sm:$0xff] }
  0x41   :  { %v1299_v42 = vpack.c.bf16 %v64_v35, %v48_v34  ;;  %v63_v43 = vld [vmem:[#allocation5 + $0xb0] sm:$0xff]  ;;  %v78_v44 = vld [vmem:[#allocation5 + $0x128] sm:$0xff]  ;;  %v80_v46 = vld [vmem:[#allocation5 + $0x138] sm:$0xff]  ;;  %v1269_v49 = vpack.c.bf16 %v61_v40, %v45_v39 }
  0x42   :  { %1226 = vmatpush1.bf16.msra.mxu0 %v1225_v12  ;;  %v94_v45 = vld [vmem:[#allocation5 + $0x1a8] sm:$0xff]  ;;  %v96_v47 = vld [vmem:[#allocation5 + $0x1b8] sm:$0xff]  ;;  %v1301_v50 = vpack.c.bf16 %v63_v43, %v47_v41  ;;  %v77_v52 = vld [vmem:[#allocation5 + $0x120] sm:$0xff] }
  0x43   :  { %1258 = vmatpush1.bf16.msra.mxu1 %v1257_v13  ;;  %1228 = vmatprep.subr.bf16.mxu0 %v1227_v14  ;;  %v1594_v48 = vld [vmem:[#allocation2] sm:$0xff]  ;;  %v1271_v51 = vpack.c.bf16 %v94_v45, %v78_v44  ;;  %v93_v53 = vld [vmem:[#allocation5 + $0x1a0] sm:$0xff]  ;;  %v79_v54 = vld [vmem:[#allocation5 + $0x130] sm:$0xff]  ;;  %v1303_v55 = vpack.c.bf16 %v96_v47, %v80_v46 }
  0x44   :  { %1260 = vmatprep.subr.bf16.mxu1 %v1259_v18  ;;  %v95_v56 = vld [vmem:[#allocation5 + $0x1b0] sm:$0xff]  ;;  %v110_v57 = vld [vmem:[#allocation5 + $0x228] sm:$0xff]  ;;  %v112_v59 = vld [vmem:[#allocation5 + $0x238] sm:$0xff]  ;;  %v1273_v61 = vpack.c.bf16 %v93_v53, %v77_v52 }
  0x45   :  { %v126_v58 = vld [vmem:[#allocation5 + $0x2a8] sm:$0xff]  ;;  %v128_v60 = vld [vmem:[#allocation5 + $0x2b8] sm:$0xff]  ;;  %v1305_v62 = vpack.c.bf16 %v95_v56, %v79_v54  ;;  %v109_v1 = vld [vmem:[#allocation5 + $0x220] sm:$0xff] }
  0x46   :  { %1230 = vmatpush1.bf16.msra.mxu0 %v1229_v24  ;;  %v1275_v63 = vpack.c.bf16 %v126_v58, %v110_v57  ;;  %v125_v2 = vld [vmem:[#allocation5 + $0x2a0] sm:$0xff]  ;;  %v111_v3 = vld [vmem:[#allocation5 + $0x230] sm:$0xff]  ;;  %v1307_v4 = vpack.c.bf16 %v128_v60, %v112_v59  ;;  %v142_v6 = vld [vmem:[#allocation5 + $0x328] sm:$0xff] }
  0x47   :  { %1262 = vmatpush1.bf16.msra.mxu1 %v1261_v25  ;;  %1232 = vmatprep.subr.bf16.mxu0 %v1231_v26  ;;  %v127_v5 = vld [vmem:[#allocation5 + $0x2b0] sm:$0xff]  ;;  %v158_v7 = vld [vmem:[#allocation5 + $0x3a8] sm:$0xff]  ;;  %v144_v8 = vld [vmem:[#allocation5 + $0x338] sm:$0xff]  ;;  %v1277_v10 = vpack.c.bf16 %v125_v2, %v109_v1 }
  0x48   :  { %1264 = vmatprep.subr.bf16.mxu1 %v1263_v30  ;;  %v160_v9 = vld [vmem:[#allocation5 + $0x3b8] sm:$0xff]  ;;  %v1309_v11 = vpack.c.bf16 %v127_v5, %v111_v3  ;;  %v1279_v12 = vpack.c.bf16 %v158_v7, %v142_v6  ;;  %v141_v13 = vld [vmem:[#allocation5 + $0x320] sm:$0xff]  ;;  %v143_v15 = vld [vmem:[#allocation5 + $0x330] sm:$0xff] }
  0x49   :  { %v157_v14 = vld [vmem:[#allocation5 + $0x3a0] sm:$0xff]  ;;  %v1311_v16 = vpack.c.bf16 %v160_v9, %v144_v8  ;;  %v159_v17 = vld [vmem:[#allocation5 + $0x3b0] sm:$0xff]  ;;  %v174_v18 = vld [vmem:[#allocation5 + $0x428] sm:$0xff] }
  0x4a   :  { %1234 = vmatpush1.bf16.msra.mxu0 %v1233_v36  ;;  %v190_v19 = vld [vmem:[#allocation5 + $0x4a8] sm:$0xff]  ;;  %v176_v20 = vld [vmem:[#allocation5 + $0x438] sm:$0xff]  ;;  %v1281_v22 = vpack.c.bf16 %v157_v14, %v141_v13  ;;  %v1313_v23 = vpack.c.bf16 %v159_v17, %v143_v15  ;;  %v173_v25 = vld [vmem:[#allocation5 + $0x420] sm:$0xff] }
  0x4b   :  { %1266 = vmatpush1.bf16.msra.mxu1 %v1265_v37  ;;  %1268 = vmatprep.subr.bf16.mxu0 %v1267_v38  ;;  %v192_v21 = vld [vmem:[#allocation5 + $0x4b8] sm:$0xff]  ;;  %v1283_v24 = vpack.c.bf16 %v190_v19, %v174_v18  ;;  %v189_v26 = vld [vmem:[#allocation5 + $0x4a0] sm:$0xff]  ;;  %v175_v27 = vld [vmem:[#allocation5 + $0x430] sm:$0xff] }
  0x4c   :  { %1300 = vmatprep.subr.bf16.mxu1 %v1299_v42  ;;  %v1315_v28 = vpack.c.bf16 %v192_v21, %v176_v20  ;;  %v191_v29 = vld [vmem:[#allocation5 + $0x4b0] sm:$0xff]  ;;  %v206_v30 = vld [vmem:[#allocation5 + $0x528] sm:$0xff]  ;;  %v208_v32 = vld [vmem:[#allocation5 + $0x538] sm:$0xff]  ;;  %v1285_v34 = vpack.c.bf16 %v189_v26, %v173_v25 }
  0x4d   :  { %362 = vmatmul.mubr.f32.vlgmr.msra.gmra.mrb[0].mxu0 %v1594_v48  ;;  %v222_v31 = vld [vmem:[#allocation5 + $0x5a8] sm:$0xff]  ;;  %v224_v33 = vld [vmem:[#allocation5 + $0x5b8] sm:$0xff]  ;;  %v1317_v35 = vpack.c.bf16 %v191_v29, %v175_v27  ;;  %v205_v37 = vld [vmem:[#allocation5 + $0x520] sm:$0xff] }
  0x4e   :  { %433 = vmatmul.mubr.f32.vlgmr.msra.gmra.mrb[0].mxu1 %v1594_v48  ;;  %1270 = vmatpush1.bf16.msra.mxu0 %v1269_v49  ;;  %v1287_v36 = vpack.c.bf16 %v222_v31, %v206_v30  ;;  %v221_v38 = vld [vmem:[#allocation5 + $0x5a0] sm:$0xff]  ;;  %v207_v39 = vld [vmem:[#allocation5 + $0x530] sm:$0xff]  ;;  %v1319_v40 = vpack.c.bf16 %v224_v33, %v208_v32  ;;  %v238_v42 = vld [vmem:[#allocation5 + $0x628] sm:$0xff] }
  0x4f   :  { %1302 = vmatpush1.bf16.msra.mxu1 %v1301_v50  ;;  %1272 = vmatprep.subr.bf16.mxu0 %v1271_v51  ;;  %v223_v41 = vld [vmem:[#allocation5 + $0x5b0] sm:$0xff]  ;;  %v254_v43 = vld [vmem:[#allocation5 + $0x6a8] sm:$0xff]  ;;  %v240_v44 = vld [vmem:[#allocation5 + $0x638] sm:$0xff]  ;;  %v1289_v46 = vpack.c.bf16 %v221_v38, %v205_v37 }
  0x50   :  { %1304 = vmatprep.subr.bf16.mxu1 %v1303_v55  ;;  %503 = vmatprep.mubr.f32.mxu0 %v1547_v0  ;;  %v256_v45 = vld [vmem:[#allocation5 + $0x6b8] sm:$0xff]  ;;  %v1321_v47 = vpack.c.bf16 %v223_v41, %v207_v39  ;;  %v1291_v49 = vpack.c.bf16 %v254_v43, %v238_v42  ;;  %v237_v50 = vld [vmem:[#allocation5 + $0x620] sm:$0xff]  ;;  %v239_v52 = vld [vmem:[#allocation5 + $0x630] sm:$0xff] }
  0x51   :  { %574 = vmatprep.mubr.f32.mxu1 %v1547_v0  ;;  %v253_v51 = vld [vmem:[#allocation5 + $0x6a0] sm:$0xff]  ;;  %v1323_v53 = vpack.c.bf16 %v256_v45, %v240_v44  ;;  %v255_v54 = vld [vmem:[#allocation5 + $0x6b0] sm:$0xff]  ;;  %v270_v55 = vld [vmem:[#allocation5 + $0x728] sm:$0xff] }
  0x52   :  { %1274 = vmatpush1.bf16.msra.mxu0 %v1273_v61  ;;  %v286_v56 = vld [vmem:[#allocation5 + $0x7a8] sm:$0xff]  ;;  %v272_v57 = vld [vmem:[#allocation5 + $0x738] sm:$0xff]  ;;  %v1293_v59 = vpack.c.bf16 %v253_v51, %v237_v50  ;;  %v1325_v60 = vpack.c.bf16 %v255_v54, %v239_v52  ;;  %v271_v1 = vld [vmem:[#allocation5 + $0x730] sm:$0xff] }
  0x53   :  { %1306 = vmatpush1.bf16.msra.mxu1 %v1305_v62  ;;  %1276 = vmatprep.subr.bf16.mxu0 %v1275_v63  ;;  %v288_v58 = vld [vmem:[#allocation5 + $0x7b8] sm:$0xff]  ;;  %v1295_v61 = vpack.c.bf16 %v286_v56, %v270_v55  ;;  %v269_v62 = vld [vmem:[#allocation5 + $0x720] sm:$0xff]  ;;  %v287_v3 = vld [vmem:[#allocation5 + $0x7b0] sm:$0xff] }
  0x54   :  { %1308 = vmatprep.subr.bf16.mxu1 %v1307_v4  ;;  %v285_v63 = vld [vmem:[#allocation5 + $0x7a0] sm:$0xff]  ;;  %v1327_v2 = vpack.c.bf16 %v288_v58, %v272_v57  ;;  %v50_v4 = vld [vmem:[#allocation5 + $0x48] sm:$0xff]  ;;  %v52_v6 = vld [vmem:[#allocation5 + $0x58] sm:$0xff]  ;;  %v1329_v9 = vpack.c.bf16 %v287_v3, %v271_v1 }
  0x55   :  { %v66_v5 = vld [vmem:[#allocation5 + $0xc8] sm:$0xff]  ;;  %v68_v7 = vld [vmem:[#allocation5 + $0xd8] sm:$0xff]  ;;  %v1297_v8 = vpack.c.bf16 %v285_v63, %v269_v62  ;;  %v51_v13 = vld [vmem:[#allocation5 + $0x50] sm:$0xff] }
  0x56   :  { %1278 = vmatpush1.bf16.msra.mxu0 %v1277_v10  ;;  %v1331_v10 = vpack.c.bf16 %v66_v5, %v50_v4  ;;  %v1363_v14 = vpack.c.bf16 %v68_v7, %v52_v6  ;;  %v67_v15 = vld [vmem:[#allocation5 + $0xd0] sm:$0xff]  ;;  %v98_v17 = vld [vmem:[#allocation5 + $0x1c8] sm:$0xff]  ;;  %v84_v18 = vld [vmem:[#allocation5 + $0x158] sm:$0xff] }
  0x57   :  { %1310 = vmatpush1.bf16.msra.mxu1 %v1309_v11  ;;  %1280 = vmatprep.subr.bf16.mxu0 %v1279_v12  ;;  %v49_v11 = vld [vmem:[#allocation5 + $0x40] sm:$0xff]  ;;  %v100_v19 = vld [vmem:[#allocation5 + $0x1d8] sm:$0xff]  ;;  %v1365_v21 = vpack.c.bf16 %v67_v15, %v51_v13  ;;  %v83_v25 = vld [vmem:[#allocation5 + $0x150] sm:$0xff] }
  0x58   :  { %1312 = vmatprep.subr.bf16.mxu1 %v1311_v16  ;;  %v65_v12 = vld [vmem:[#allocation5 + $0xc0] sm:$0xff]  ;;  %v82_v16 = vld [vmem:[#allocation5 + $0x148] sm:$0xff]  ;;  %v1367_v26 = vpack.c.bf16 %v100_v19, %v84_v18  ;;  %v99_v27 = vld [vmem:[#allocation5 + $0x1d0] sm:$0xff] }
  0x59   :  { %v1333_v20 = vpack.c.bf16 %v65_v12, %v49_v11  ;;  %v130_v29 = vld [vmem:[#allocation5 + $0x2c8] sm:$0xff]  ;;  %v116_v30 = vld [vmem:[#allocation5 + $0x258] sm:$0xff]  ;;  %v1369_v33 = vpack.c.bf16 %v99_v27, %v83_v25  ;;  %v115_v37 = vld [vmem:[#allocation5 + $0x250] sm:$0xff] }
  0x5a   :  { %1282 = vmatpush1.bf16.msra.mxu0 %v1281_v22  ;;  %v1335_v22 = vpack.c.bf16 %v98_v17, %v82_v16  ;;  %v132_v31 = vld [vmem:[#allocation5 + $0x2d8] sm:$0xff]  ;;  %v131_v39 = vld [vmem:[#allocation5 + $0x2d0] sm:$0xff]  ;;  %v162_v41 = vld [vmem:[#allocation5 + $0x3c8] sm:$0xff] }
  0x5b   :  { %1314 = vmatpush1.bf16.msra.mxu1 %v1313_v23  ;;  %1284 = vmatprep.subr.bf16.mxu0 %v1283_v24  ;;  %v81_v23 = vld [vmem:[#allocation5 + $0x140] sm:$0xff]  ;;  %v1371_v38 = vpack.c.bf16 %v132_v31, %v116_v30  ;;  %v148_v42 = vld [vmem:[#allocation5 + $0x358] sm:$0xff]  ;;  %v1373_v45 = vpack.c.bf16 %v131_v39, %v115_v37  ;;  %v147_v50 = vld [vmem:[#allocation5 + $0x350] sm:$0xff] }
  0x5c   :  { %1316 = vmatprep.subr.bf16.mxu1 %v1315_v28  ;;  %v97_v24 = vld [vmem:[#allocation5 + $0x1c0] sm:$0xff]  ;;  %v114_v28 = vld [vmem:[#allocation5 + $0x248] sm:$0xff]  ;;  %v164_v43 = vld [vmem:[#allocation5 + $0x3d8] sm:$0xff] }
  0x5d   :  { %v1337_v32 = vpack.c.bf16 %v97_v24, %v81_v23  ;;  %v1375_v51 = vpack.c.bf16 %v164_v43, %v148_v42  ;;  %v163_v52 = vld [vmem:[#allocation5 + $0x3d0] sm:$0xff]  ;;  %v194_v54 = vld [vmem:[#allocation5 + $0x4c8] sm:$0xff]  ;;  %v180_v55 = vld [vmem:[#allocation5 + $0x458] sm:$0xff] }
  0x5e   :  { %1286 = vmatpush1.bf16.msra.mxu0 %v1285_v34  ;;  %v1339_v34 = vpack.c.bf16 %v130_v29, %v114_v28  ;;  %v196_v56 = vld [vmem:[#allocation5 + $0x4d8] sm:$0xff]  ;;  %v1377_v58 = vpack.c.bf16 %v163_v52, %v147_v50  ;;  %v179_v62 = vld [vmem:[#allocation5 + $0x450] sm:$0xff]  ;;  %v226_v3 = vld [vmem:[#allocation5 + $0x5c8] sm:$0xff] }
  0x5f   :  { %1318 = vmatpush1.bf16.msra.mxu1 %v1317_v35  ;;  %1288 = vmatprep.subr.bf16.mxu0 %v1287_v36  ;;  %v113_v35 = vld [vmem:[#allocation5 + $0x240] sm:$0xff]  ;;  %v1379_v63 = vpack.c.bf16 %v196_v56, %v180_v55  ;;  %v195_v1 = vld [vmem:[#allocation5 + $0x4d0] sm:$0xff]  ;;  %v212_v4 = vld [vmem:[#allocation5 + $0x558] sm:$0xff] }
  0x60   :  { %1320 = vmatprep.subr.bf16.mxu1 %v1319_v40  ;;  %v129_v36 = vld [vmem:[#allocation5 + $0x2c0] sm:$0xff]  ;;  %v146_v40 = vld [vmem:[#allocation5 + $0x348] sm:$0xff]  ;;  %v228_v5 = vld [vmem:[#allocation5 + $0x5d8] sm:$0xff]  ;;  %v1381_v7 = vpack.c.bf16 %v195_v1, %v179_v62 }
  0x61   :  { %v1341_v44 = vpack.c.bf16 %v129_v36, %v113_v35  ;;  %v211_v11 = vld [vmem:[#allocation5 + $0x550] sm:$0xff]  ;;  %v1383_v12 = vpack.c.bf16 %v228_v5, %v212_v4  ;;  %v258_v15 = vld [vmem:[#allocation5 + $0x6c8] sm:$0xff]  ;;  %v244_v16 = vld [vmem:[#allocation5 + $0x658] sm:$0xff] }
  0x62   :  { %1290 = vmatpush1.bf16.msra.mxu0 %v1289_v46  ;;  %v1343_v46 = vpack.c.bf16 %v162_v41, %v146_v40  ;;  %v227_v13 = vld [vmem:[#allocation5 + $0x5d0] sm:$0xff]  ;;  %v260_v17 = vld [vmem:[#allocation5 + $0x6d8] sm:$0xff]  ;;  %v290_v27 = vld [vmem:[#allocation5 + $0x7c8] sm:$0xff] }
  0x63   :  { %1322 = vmatpush1.bf16.msra.mxu1 %v1321_v47  ;;  %1292 = vmatprep.subr.bf16.mxu0 %v1291_v49  ;;  %v145_v47 = vld [vmem:[#allocation5 + $0x340] sm:$0xff]  ;;  %v1385_v19 = vpack.c.bf16 %v227_v13, %v211_v11  ;;  %v243_v23 = vld [vmem:[#allocation5 + $0x650] sm:$0xff]  ;;  %v1387_v24 = vpack.c.bf16 %v260_v17, %v244_v16  ;;  %v276_v28 = vld [vmem:[#allocation5 + $0x758] sm:$0xff] }
  0x64   :  { %1324 = vmatprep.subr.bf16.mxu1 %v1323_v53  ;;  %v161_v49 = vld [vmem:[#allocation5 + $0x3c0] sm:$0xff]  ;;  %v178_v53 = vld [vmem:[#allocation5 + $0x448] sm:$0xff]  ;;  %v259_v25 = vld [vmem:[#allocation5 + $0x6d0] sm:$0xff] }
  0x65   :  { %v1345_v57 = vpack.c.bf16 %v161_v49, %v145_v47  ;;  %v292_v29 = vld [vmem:[#allocation5 + $0x7d8] sm:$0xff]  ;;  %v1389_v31 = vpack.c.bf16 %v259_v25, %v243_v23  ;;  %v275_v35 = vld [vmem:[#allocation5 + $0x750] sm:$0xff]  ;;  %v70_v39 = vld [vmem:[#allocation5 + $0xe8] sm:$0xff] }
  0x66   :  { %1294 = vmatpush1.bf16.msra.mxu0 %v1293_v59  ;;  %v1347_v59 = vpack.c.bf16 %v194_v54, %v178_v53  ;;  %v1391_v36 = vpack.c.bf16 %v292_v29, %v276_v28  ;;  %v291_v37 = vld [vmem:[#allocation5 + $0x7d0] sm:$0xff]  ;;  %v56_v40 = vld [vmem:[#allocation5 + $0x78] sm:$0xff]  ;;  %v102_v52 = vld [vmem:[#allocation5 + $0x1e8] sm:$0xff] }
  0x67   :  { %1326 = vmatpush1.bf16.msra.mxu1 %v1325_v60  ;;  %1296 = vmatprep.subr.bf16.mxu0 %v1295_v61  ;;  %v177_v60 = vld [vmem:[#allocation5 + $0x440] sm:$0xff]  ;;  %v72_v41 = vld [vmem:[#allocation5 + $0xf8] sm:$0xff]  ;;  %v1393_v43 = vpack.c.bf16 %v291_v37, %v275_v35  ;;  %v55_v47 = vld [vmem:[#allocation5 + $0x70] sm:$0xff] }
  0x68   :  { %1328 = vmatprep.subr.bf16.mxu1 %v1327_v2  ;;  %v193_v61 = vld [vmem:[#allocation5 + $0x4c0] sm:$0xff]  ;;  %v210_v2 = vld [vmem:[#allocation5 + $0x548] sm:$0xff]  ;;  %v1427_v49 = vpack.c.bf16 %v72_v41, %v56_v40  ;;  %v71_v50 = vld [vmem:[#allocation5 + $0xf0] sm:$0xff] }
  0x69   :  { %v1349_v6 = vpack.c.bf16 %v193_v61, %v177_v60  ;;  %v88_v53 = vld [vmem:[#allocation5 + $0x178] sm:$0xff]  ;;  %v1429_v56 = vpack.c.bf16 %v71_v50, %v55_v47  ;;  %v87_v60 = vld [vmem:[#allocation5 + $0x170] sm:$0xff]  ;;  %v134_v1 = vld [vmem:[#allocation5 + $0x2e8] sm:$0xff] }
  0x6a   :  { %1298 = vmatpush1.bf16.msra.mxu0 %v1297_v8  ;;  %v1351_v8 = vpack.c.bf16 %v226_v3, %v210_v2  ;;  %v104_v54 = vld [vmem:[#allocation5 + $0x1f8] sm:$0xff]  ;;  %v103_v62 = vld [vmem:[#allocation5 + $0x1f0] sm:$0xff]  ;;  %v166_v13 = vld [vmem:[#allocation5 + $0x3e8] sm:$0xff] }
  0x6b   :  { %1330 = vmatpush1.bf16.msra.mxu1 %v1329_v9  ;;  %1332 = vmatprep.subr.bf16.mxu0 %v1331_v10  ;;  %v209_v9 = vld [vmem:[#allocation5 + $0x540] sm:$0xff]  ;;  %v1431_v61 = vpack.c.bf16 %v104_v54, %v88_v53  ;;  %v120_v2 = vld [vmem:[#allocation5 + $0x278] sm:$0xff]  ;;  %v1433_v5 = vpack.c.bf16 %v103_v62, %v87_v60  ;;  %v135_v11 = vld [vmem:[#allocation5 + $0x2f0] sm:$0xff] }
  0x6c   :  { %1364 = vmatprep.subr.bf16.mxu1 %v1363_v14  ;;  %v225_v10 = vld [vmem:[#allocation5 + $0x5c0] sm:$0xff]  ;;  %v242_v14 = vld [vmem:[#allocation5 + $0x648] sm:$0xff]  ;;  %v136_v3 = vld [vmem:[#allocation5 + $0x2f8] sm:$0xff] }
  0x6d   :  { %504 = vmatmul.mubr.f32.vlgmr.msra.gmra.mrb[2].mxu0 %v1594_v48  ;;  %v1353_v18 = vpack.c.bf16 %v225_v10, %v209_v9  ;;  %v119_v9 = vld [vmem:[#allocation5 + $0x270] sm:$0xff]  ;;  %v1435_v10 = vpack.c.bf16 %v136_v3, %v120_v2  ;;  %v198_v25 = vld [vmem:[#allocation5 + $0x4e8] sm:$0xff]  ;;  %v216_v37 = vld [vmem:[#allocation5 + $0x578] sm:$0xff] }
  0x6e   :  { %575 = vmatmul.mubr.f32.vlgmr.msra.gmra.mrb[2].mxu1 %v1594_v48  ;;  %1334 = vmatpush1.bf16.msra.mxu0 %v1333_v20  ;;  %v1355_v20 = vpack.c.bf16 %v258_v15, %v242_v14  ;;  %v152_v14 = vld [vmem:[#allocation5 + $0x378] sm:$0xff]  ;;  %v1437_v17 = vpack.c.bf16 %v135_v11, %v119_v9  ;;  %v167_v23 = vld [vmem:[#allocation5 + $0x3f0] sm:$0xff]  ;;  %v214_v35 = vld [vmem:[#allocation5 + $0x568] sm:$0xff]  ;;  %v1548_v11 = vmov 1966171168  }
  0x6f   :  { %1366 = vmatpush1.bf16.msra.mxu1 %v1365_v21  ;;  %1336 = vmatprep.subr.bf16.mxu0 %v1335_v22  ;;  %v241_v21 = vld [vmem:[#allocation5 + $0x640] sm:$0xff]  ;;  %v168_v15 = vld [vmem:[#allocation5 + $0x3f8] sm:$0xff]  ;;  %v246_v47 = vld [vmem:[#allocation5 + $0x668] sm:$0xff] }
  0x70   :  { %1368 = vmatprep.subr.bf16.mxu1 %v1367_v26  ;;  %645 = vmatprep.mubr.f32.mxu0 %v1547_v0  ;;  %v257_v22 = vld [vmem:[#allocation5 + $0x6c0] sm:$0xff]  ;;  %v274_v26 = vld [vmem:[#allocation5 + $0x748] sm:$0xff]  ;;  %v248_v50 = vld [vmem:[#allocation5 + $0x678] sm:$0xff] }
  0x71   :  { %716 = vmatprep.mubr.f32.mxu1 %v1547_v0  ;;  %v1357_v30 = vpack.c.bf16 %v257_v22, %v241_v21  ;;  %v151_v21 = vld [vmem:[#allocation5 + $0x370] sm:$0xff]  ;;  %v1439_v22 = vpack.c.bf16 %v168_v15, %v152_v14  ;;  %v278_v60 = vld [vmem:[#allocation5 + $0x768] sm:$0xff]  ;;  %v280_v62 = vld [vmem:[#allocation5 + $0x778] sm:$0xff] }
  0x72   :  { %1338 = vmatpush1.bf16.msra.mxu0 %v1337_v32  ;;  %v1359_v32 = vpack.c.bf16 %v290_v27, %v274_v26  ;;  %v184_v26 = vld [vmem:[#allocation5 + $0x478] sm:$0xff] }
  0x73   :  { %1370 = vmatpush1.bf16.msra.mxu1 %v1369_v33  ;;  %1340 = vmatprep.subr.bf16.mxu0 %v1339_v34  ;;  %v273_v33 = vld [vmem:[#allocation5 + $0x740] sm:$0xff]  ;;  %v200_v27 = vld [vmem:[#allocation5 + $0x4f8] sm:$0xff] }
  0x74   :  { %1372 = vmatprep.subr.bf16.mxu1 %v1371_v38  ;;  %v289_v34 = vld [vmem:[#allocation5 + $0x7c0] sm:$0xff]  ;;  %v54_v38 = vld [vmem:[#allocation5 + $0x68] sm:$0xff] }
  0x75   :  { %v1361_v42 = vpack.c.bf16 %v289_v34, %v273_v33  ;;  %v1443_v33 = vpack.c.bf16 %v200_v27, %v184_v26  ;;  %v199_v34 = vld [vmem:[#allocation5 + $0x4f0] sm:$0xff] }
  0x76   :  { %1342 = vmatpush1.bf16.msra.mxu0 %v1341_v44  ;;  %v1395_v44 = vpack.c.bf16 %v70_v39, %v54_v38  ;;  %v232_v38 = vld [vmem:[#allocation5 + $0x5f8] sm:$0xff] }
  0x77   :  { %1374 = vmatpush1.bf16.msra.mxu1 %v1373_v45  ;;  %1344 = vmatprep.subr.bf16.mxu0 %v1343_v46  ;;  %v53_v45 = vld [vmem:[#allocation5 + $0x60] sm:$0xff] }
  0x78   :  { %1376 = vmatprep.subr.bf16.mxu1 %v1375_v51  ;;  %v69_v46 = vld [vmem:[#allocation5 + $0xe0] sm:$0xff]  ;;  %v86_v51 = vld [vmem:[#allocation5 + $0x168] sm:$0xff] }
  0x79   :  { %v1397_v55 = vpack.c.bf16 %v69_v46, %v53_v45  ;;  %v1447_v45 = vpack.c.bf16 %v232_v38, %v216_v37  ;;  %v231_v46 = vld [vmem:[#allocation5 + $0x5f0] sm:$0xff] }
  0x7a   :  { %1346 = vmatpush1.bf16.msra.mxu0 %v1345_v57  ;;  %v1399_v57 = vpack.c.bf16 %v102_v52, %v86_v51  ;;  %v264_v51 = vld [vmem:[#allocation5 + $0x6f8] sm:$0xff] }
  0x7b   :  { %1378 = vmatpush1.bf16.msra.mxu1 %v1377_v58  ;;  %1348 = vmatprep.subr.bf16.mxu0 %v1347_v59  ;;  %v85_v58 = vld [vmem:[#allocation5 + $0x160] sm:$0xff] }
  0x7c   :  { %1380 = vmatprep.subr.bf16.mxu1 %v1379_v63  ;;  %v101_v59 = vld [vmem:[#allocation5 + $0x1e0] sm:$0xff]  ;;  %v118_v63 = vld [vmem:[#allocation5 + $0x268] sm:$0xff] }
  0x7d   :  { %v1401_v4 = vpack.c.bf16 %v101_v59, %v85_v58  ;;  %v1451_v58 = vpack.c.bf16 %v264_v51, %v248_v50  ;;  %v263_v59 = vld [vmem:[#allocation5 + $0x6f0] sm:$0xff] }
  0x7e   :  { %1350 = vmatpush1.bf16.msra.mxu0 %v1349_v6  ;;  %v1403_v6 = vpack.c.bf16 %v134_v1, %v118_v63  ;;  %v296_v63 = vld [vmem:[#allocation5 + $0x7f8] sm:$0xff] }
  0x7f   :  { %1382 = vmatpush1.bf16.msra.mxu1 %v1381_v7  ;;  %1352 = vmatprep.subr.bf16.mxu0 %v1351_v8  ;;  %v117_v7 = vld [vmem:[#allocation5 + $0x260] sm:$0xff] }
  0x80   :  { %1384 = vmatprep.subr.bf16.mxu1 %v1383_v12  ;;  %v133_v8 = vld [vmem:[#allocation5 + $0x2e0] sm:$0xff]  ;;  %v150_v12 = vld [vmem:[#allocation5 + $0x368] sm:$0xff] }
  0x81   :  { %v1405_v16 = vpack.c.bf16 %v133_v8, %v117_v7  ;;  %v279_v7 = vld [vmem:[#allocation5 + $0x770] sm:$0xff] }
  0x82   :  { %1354 = vmatpush1.bf16.msra.mxu0 %v1353_v18  ;;  %v1407_v18 = vpack.c.bf16 %v166_v13, %v150_v12  ;;  %v295_v8 = vld [vmem:[#allocation5 + $0x7f0] sm:$0xff]  ;;  %v890_v12 = vunpack.c.l.s4 %v1548_v11  ;;  %v892_v13 = vlaneseq }
  0x83   :  { %1386 = vmatpush1.bf16.msra.mxu1 %v1385_v19  ;;  %1356 = vmatprep.subr.bf16.mxu0 %v1355_v20  ;;  %v149_v19 = vld [vmem:[#allocation5 + $0x360] sm:$0xff] }
  0x84   :  { %1388 = vmatprep.subr.bf16.mxu1 %v1387_v24  ;;  %v165_v20 = vld [vmem:[#allocation5 + $0x3e0] sm:$0xff]  ;;  %v182_v24 = vld [vmem:[#allocation5 + $0x468] sm:$0xff]  ;;  %v891_v14 = vunpack.c.0.s8 %v890_v12  ;;  %v893_v15 = vshrl.u32 %v892_v13, 7 }
  0x85   :  { %v1409_v28 = vpack.c.bf16 %v165_v20, %v149_v19  ;;  %v1411_v29 = vpack.c.bf16 %v198_v25, %v182_v24 }
  0x86   :  { %1358 = vmatpush1.bf16.msra.mxu0 %v1357_v30  ;;  %v181_v30 = vld [vmem:[#allocation5 + $0x460] sm:$0xff] }
  0x87   :  { %1390 = vmatpush1.bf16.msra.mxu1 %v1389_v31  ;;  %1360 = vmatprep.subr.bf16.mxu0 %v1359_v32  ;;  %v197_v31 = vld [vmem:[#allocation5 + $0x4e0] sm:$0xff]  ;;  %v183_v32 = vld [vmem:[#allocation5 + $0x470] sm:$0xff] }
  0x88   :  { %1392 = vmatprep.subr.bf16.mxu1 %v1391_v36  ;;  %v230_v36 = vld [vmem:[#allocation5 + $0x5e8] sm:$0xff]  ;;  %v1413_v39 = vpack.c.bf16 %v197_v31, %v181_v30  ;;  %v1445_v40 = vpack.c.bf16 %v199_v34, %v183_v32 }
  0x89   :  { %v1415_v41 = vpack.c.bf16 %v230_v36, %v214_v35 }
  0x8a   :  { %1362 = vmatpush1.bf16.msra.mxu0 %v1361_v42  ;;  %v213_v42 = vld [vmem:[#allocation5 + $0x560] sm:$0xff] }
  0x8b   :  { %1394 = vmatpush1.bf16.msra.mxu1 %v1393_v43  ;;  %1396 = vmatprep.subr.bf16.mxu0 %v1395_v44  ;;  %v229_v43 = vld [vmem:[#allocation5 + $0x5e0] sm:$0xff]  ;;  %v215_v44 = vld [vmem:[#allocation5 + $0x570] sm:$0xff] }
  0x8c   :  { %1428 = vmatprep.subr.bf16.mxu1 %v1427_v49  ;;  %v262_v49 = vld [vmem:[#allocation5 + $0x6e8] sm:$0xff]  ;;  %v1417_v52 = vpack.c.bf16 %v229_v43, %v213_v42  ;;  %v1449_v53 = vpack.c.bf16 %v231_v46, %v215_v44 }
  0x8d   :  { %646 = vmatmul.mubr.f32.vlgmr.msra.gmra.mrb[4].mxu0 %v1594_v48  ;;  %v1419_v54 = vpack.c.bf16 %v262_v49, %v246_v47 }
  0x8e   :  { %717 = vmatmul.mubr.f32.vlgmr.msra.gmra.mrb[4].mxu1 %v1594_v48  ;;  %1398 = vmatpush1.bf16.msra.mxu0 %v1397_v55  ;;  %v245_v55 = vld [vmem:[#allocation5 + $0x660] sm:$0xff] }
  0x8f   :  { %1430 = vmatpush1.bf16.msra.mxu1 %v1429_v56  ;;  %1400 = vmatprep.subr.bf16.mxu0 %v1399_v57  ;;  %v261_v56 = vld [vmem:[#allocation5 + $0x6e0] sm:$0xff]  ;;  %v247_v57 = vld [vmem:[#allocation5 + $0x670] sm:$0xff] }
  0x90   :  { %1432 = vmatprep.subr.bf16.mxu1 %v1431_v61  ;;  %787 = vmatprep.mubr.f32.mxu0 %v1547_v0  ;;  %v294_v61 = vld [vmem:[#allocation5 + $0x7e8] sm:$0xff]  ;;  %v1421_v1 = vpack.c.bf16 %v261_v56, %v245_v55  ;;  %v1453_v2 = vpack.c.bf16 %v263_v59, %v247_v57 }
  0x91   :  { %858 = vmatprep.mubr.f32.mxu1 %v1547_v0  ;;  %v1441_v0 = vpack.c.bf16 %v167_v23, %v151_v21  ;;  %v1423_v3 = vpack.c.bf16 %v294_v61, %v278_v60 }
  0x92   :  { %1402 = vmatpush1.bf16.msra.mxu0 %v1401_v4  ;;  %v277_v4 = vld [vmem:[#allocation5 + $0x760] sm:$0xff] }
  0x93   :  { %1434 = vmatpush1.bf16.msra.mxu1 %v1433_v5  ;;  %1404 = vmatprep.subr.bf16.mxu0 %v1403_v6  ;;  %v293_v5 = vld [vmem:[#allocation5 + $0x7e0] sm:$0xff]  ;;  %v1455_v6 = vpack.c.bf16 %v296_v63, %v280_v62 }
  0x94   :  { %1436 = vmatprep.subr.bf16.mxu1 %v1435_v10  ;;  %v1425_v9 = vpack.c.bf16 %v293_v5, %v277_v4  ;;  %v1457_v10 = vpack.c.bf16 %v295_v8, %v279_v7 }
  0x96   :  { %1406 = vmatpush1.bf16.msra.mxu0 %v1405_v16 }
  0x97   :  { %1438 = vmatpush1.bf16.msra.mxu1 %v1437_v17  ;;  %1408 = vmatprep.subr.bf16.mxu0 %v1407_v18  ;;  %v1610_v17 = vsub.s32 %v891_v14, %v893_v15 }
  0x98   :  { %1440 = vmatprep.subr.bf16.mxu1 %v1439_v22 }
  0x9a   :  { %1410 = vmatpush1.bf16.msra.mxu0 %v1409_v28 }
  0x9b   :  { %1442 = vmatpush1.bf16.msra.mxu1 %v1441_v0  ;;  %1412 = vmatprep.subr.bf16.mxu0 %v1411_v29 }
  0x9c   :  { %1444 = vmatprep.subr.bf16.mxu1 %v1443_v33 }
  0x9e   :  { %1414 = vmatpush1.bf16.msra.mxu0 %v1413_v39 }
  0x9f   :  { %1446 = vmatpush1.bf16.msra.mxu1 %v1445_v40  ;;  %1416 = vmatprep.subr.bf16.mxu0 %v1415_v41 }
  0xa0   :  { %1448 = vmatprep.subr.bf16.mxu1 %v1447_v45 }
  0xa2   :  { %1418 = vmatpush1.bf16.msra.mxu0 %v1417_v52 }
  0xa3   :  { %1450 = vmatpush1.bf16.msra.mxu1 %v1449_v53  ;;  %1420 = vmatprep.subr.bf16.mxu0 %v1419_v54 }
  0xa4   :  { %1452 = vmatprep.subr.bf16.mxu1 %v1451_v58 }
  0xa6   :  { %1422 = vmatpush1.bf16.msra.mxu0 %v1421_v1 }
  0xa7   :  { %1454 = vmatpush1.bf16.msra.mxu1 %v1453_v2  ;;  %1424 = vmatprep.subr.bf16.mxu0 %v1423_v3 }
  0xa8   :  { %1456 = vmatprep.subr.bf16.mxu1 %v1455_v6 }
  0xaa   :  { %1426 = vmatpush1.bf16.msra.mxu0 %v1425_v9 }
  0xab   :  { %1458 = vmatpush1.bf16.msra.mxu1 %v1457_v10 }
  0xad   :  { %788 = vmatmul.mubr.f32.vlgmr.msra.gmra.mrb[6].mxu0 %v1594_v48 }
  0xae   :  { %859 = vmatmul.mubr.f32.vlgmr.msra.gmra.mrb[6].mxu1 %v1594_v48 }
 0x120   :  { %v363_v16 = vpop.f32.mrb[0].mxu0 }
 0x121   :  { %v434_v18 = vpop.f32.mrb[0].mxu1  ;;  %v365_v19 = vpop.f32.mrb[1].mxu0 }
 0x122   :  { %v881_v20 = vcombine.low %v363_v16, %v365_v19  ;;  %v882_v21 = vcombine.high %v363_v16, %v365_v19  ;;  %v436_v22 = vpop.f32.mrb[1].mxu1 }
 0x123   :  { %v883_v23 = vcombine.low %v434_v18, %v436_v22  ;;  %v884_v24 = vcombine.high %v434_v18, %v436_v22 }
 0x124   :  { %v895_v25 = vrot.slane %v881_v20, %v1610_v17  ;;  %v902_v26 = vrot.slane %v882_v21, %v1610_v17 }
 0x125   :  { %v909_v48 = vrot.slane %v883_v23, %v1610_v17  ;;  %v916_v27 = vrot.slane %v884_v24, %v1610_v17 }
 0x127   :  { %v945_v28 = vcombine.low %v895_v25, %v909_v48  ;;  %v946_v0 = vcombine.high %v895_v25, %v909_v48  ;;  %v947_v29 = vcombine.low %v902_v26, %v916_v27  ;;  %v948_v30 = vcombine.high %v902_v26, %v916_v27 }
 0x129   :  { %v959_v47 = vrot.slane %v945_v28, %v1610_v17  ;;  %v966_v49 = vrot.slane %v947_v29, %v1610_v17  ;;  %v973_v54 = vrot.slane %v946_v0, %v1610_v17  ;;  %v980_v55 = vrot.slane %v948_v30, %v1610_v17 }
 0x140   :  { %v505_v31 = vpop.f32.mrb[2].mxu0 }
 0x141   :  { %v576_v32 = vpop.f32.mrb[2].mxu1  ;;  %v507_v33 = vpop.f32.mrb[3].mxu0 }
 0x142   :  { %v885_v34 = vcombine.low %v505_v31, %v507_v33  ;;  %v886_v35 = vcombine.high %v505_v31, %v507_v33  ;;  %v578_v36 = vpop.f32.mrb[3].mxu1 }
 0x143   :  { %v887_v37 = vcombine.low %v576_v32, %v578_v36  ;;  %v888_v38 = vcombine.high %v576_v32, %v578_v36 }
 0x144   :  { %v923_v39 = vrot.slane %v885_v34, %v1610_v17  ;;  %v930_v40 = vrot.slane %v886_v35, %v1610_v17 }
 0x145   :  { %v937_v41 = vrot.slane %v887_v37, %v1610_v17  ;;  %v944_v42 = vrot.slane %v888_v38, %v1610_v17 }
 0x147   :  { %v949_v43 = vcombine.low %v923_v39, %v937_v41  ;;  %v950_v44 = vcombine.high %v923_v39, %v937_v41  ;;  %v951_v45 = vcombine.low %v930_v40, %v944_v42  ;;  %v952_v46 = vcombine.high %v930_v40, %v944_v42 }
 0x149   :  { %v987_v50 = vrot.slane %v949_v43, %v1610_v17  ;;  %v994_v51 = vrot.slane %v951_v45, %v1610_v17  ;;  %v1001_v52 = vrot.slane %v950_v44, %v1610_v17  ;;  %v1008_v53 = vrot.slane %v952_v46, %v1610_v17 }
 0x14b   :  { %v1009_v56 = vcombine.low %v959_v47, %v987_v50  ;;  %v1010_v57 = vcombine.high %v959_v47, %v987_v50  ;;  %v1011_v58 = vcombine.low %v966_v49, %v994_v51  ;;  %v1012_v59 = vcombine.high %v966_v49, %v994_v51 }
 0x14c   :  { %v1013_v60 = vcombine.low %v973_v54, %v1001_v52  ;;  %v1014_v61 = vcombine.high %v973_v54, %v1001_v52  ;;  %v1015_v62 = vcombine.low %v980_v55, %v1008_v53  ;;  %v1016_v63 = vcombine.high %v980_v55, %v1008_v53 }
 0x14d   :  { %1169 = vst [vmem:[#allocation7] sm:$0xff] %v1009_v56  ;;  %1173 = vst [vmem:[#allocation7 + $0x20] sm:$0xff] %v1010_v57 }
 0x14e   :  { %1177 = vst [vmem:[#allocation7 + $0x40] sm:$0xff] %v1011_v58  ;;  %1181 = vst [vmem:[#allocation7 + $0x60] sm:$0xff] %v1012_v59 }
 0x14f   :  { %1171 = vst [vmem:[#allocation7 + $0x10] sm:$0xff] %v1013_v60  ;;  %1175 = vst [vmem:[#allocation7 + $0x30] sm:$0xff] %v1014_v61 }
 0x150   :  { %1179 = vst [vmem:[#allocation7 + $0x50] sm:$0xff] %v1015_v62  ;;  %1183 = vst [vmem:[#allocation7 + $0x70] sm:$0xff] %v1016_v63 }
 0x160   :  { %v647_v1 = vpop.f32.mrb[4].mxu0 }
 0x161   :  { %v718_v2 = vpop.f32.mrb[4].mxu1  ;;  %v649_v3 = vpop.f32.mrb[5].mxu0 }
 0x162   :  { %v1017_v4 = vcombine.low %v647_v1, %v649_v3  ;;  %v1018_v5 = vcombine.high %v647_v1, %v649_v3  ;;  %v720_v6 = vpop.f32.mrb[5].mxu1 }
 0x163   :  { %v1019_v7 = vcombine.low %v718_v2, %v720_v6  ;;  %v1020_v8 = vcombine.high %v718_v2, %v720_v6 }
 0x164   :  { %v1031_v9 = vrot.slane %v1017_v4, %v1610_v17  ;;  %v1038_v10 = vrot.slane %v1018_v5, %v1610_v17 }
 0x165   :  { %v1045_v11 = vrot.slane %v1019_v7, %v1610_v17  ;;  %v1052_v12 = vrot.slane %v1020_v8, %v1610_v17 }
 0x167   :  { %v1081_v13 = vcombine.low %v1031_v9, %v1045_v11  ;;  %v1082_v14 = vcombine.high %v1031_v9, %v1045_v11  ;;  %v1083_v15 = vcombine.low %v1038_v10, %v1052_v12  ;;  %v1084_v16 = vcombine.high %v1038_v10, %v1052_v12 }
 0x169   :  { %v1095_v32 = vrot.slane %v1081_v13, %v1610_v17  ;;  %v1102_v33 = vrot.slane %v1083_v15, %v1610_v17  ;;  %v1109_v38 = vrot.slane %v1082_v14, %v1610_v17  ;;  %v1116_v39 = vrot.slane %v1084_v16, %v1610_v17 }
 0x180   :  { %v789_v18 = vpop.f32.mrb[6].mxu0 }
 0x181   :  { %v860_v19 = vpop.f32.mrb[6].mxu1  ;;  %v791_v20 = vpop.f32.mrb[7].mxu0 }
 0x182   :  { %v1021_v21 = vcombine.low %v789_v18, %v791_v20  ;;  %v1022_v22 = vcombine.high %v789_v18, %v791_v20  ;;  %v862_v23 = vpop.f32.mrb[7].mxu1 }
 0x183   :  { %v1023_v24 = vcombine.low %v860_v19, %v862_v23  ;;  %v1024_v25 = vcombine.high %v860_v19, %v862_v23 }
 0x184   :  { %v1059_v26 = vrot.slane %v1021_v21, %v1610_v17  ;;  %v1066_v48 = vrot.slane %v1022_v22, %v1610_v17 }
 0x185   :  { %v1073_v27 = vrot.slane %v1023_v24, %v1610_v17  ;;  %v1080_v28 = vrot.slane %v1024_v25, %v1610_v17 }
 0x187   :  { %v1085_v0 = vcombine.low %v1059_v26, %v1073_v27  ;;  %v1086_v29 = vcombine.high %v1059_v26, %v1073_v27  ;;  %v1087_v30 = vcombine.low %v1066_v48, %v1080_v28  ;;  %v1088_v31 = vcombine.high %v1066_v48, %v1080_v28 }
 0x189   :  { %v1123_v34 = vrot.slane %v1085_v0, %v1610_v17  ;;  %v1130_v35 = vrot.slane %v1087_v30, %v1610_v17  ;;  %v1137_v36 = vrot.slane %v1086_v29, %v1610_v17  ;;  %v1144_v37 = vrot.slane %v1088_v31, %v1610_v17 }
 0x18b   :  { %v1145_v40 = vcombine.low %v1095_v32, %v1123_v34  ;;  %v1146_v41 = vcombine.high %v1095_v32, %v1123_v34  ;;  %v1147_v42 = vcombine.low %v1102_v33, %v1130_v35  ;;  %v1148_v43 = vcombine.high %v1102_v33, %v1130_v35 }
 0x18c   :  { %v1149_v44 = vcombine.low %v1109_v38, %v1137_v36  ;;  %v1150_v45 = vcombine.high %v1109_v38, %v1137_v36  ;;  %v1151_v46 = vcombine.low %v1116_v39, %v1144_v37  ;;  %v1152_v47 = vcombine.high %v1116_v39, %v1144_v37 }
 0x18d   :  { %1170 = vst [vmem:[#allocation7 + $0x8] sm:$0xff] %v1145_v40  ;;  %1174 = vst [vmem:[#allocation7 + $0x28] sm:$0xff] %v1146_v41 }
 0x18e   :  { %1178 = vst [vmem:[#allocation7 + $0x48] sm:$0xff] %v1147_v42  ;;  %1182 = vst [vmem:[#allocation7 + $0x68] sm:$0xff] %v1148_v43 }
 0x18f   :  { %1172 = vst [vmem:[#allocation7 + $0x18] sm:$0xff] %v1149_v44  ;;  %1176 = vst [vmem:[#allocation7 + $0x38] sm:$0xff] %v1150_v45 }
 0x190   :  { %1180 = vst [vmem:[#allocation7 + $0x58] sm:$0xff] %v1151_v46  ;;  %1184 = vst [vmem:[#allocation7 + $0x78] sm:$0xff] %v1152_v47 }
 0x191   :  { %1189 = vsyncadd [#allocation4], 1792  ;;  %s1549_s1 = smov [#allocation7]  }
 0x192   :  { %s1190_s9 = sshll.u32 %s1549_s1, 4  ;;  %s1191_s9 = int_to_ptr.vmem [resolvable:$true] %s1190_s9 }
 0x193   :  { %s1513_s10 = scalar_lea.vmem %s1191_s9, 256  ;;  %s1517_s11 = scalar_lea.vmem %s1191_s9, 2048 }
 0x194   :  { %p1514_p2 = scmp.ne.s32.totalorder %s1191_s9, %s1513_s10  ;;  %p1518_p3 = scmp.lt.s32.totalorder %s1191_s9, %s1191_s9 }
 0x195   :  { %p1519_p4 = scmp.lt.s32.totalorder %s1517_s11, %s1513_s10 }
 0x197   :  { %p1520_p5 = por %p1519_p4, %p1518_p3 }
 0x199   :  { %p1521_p6 = pnand %p1520_p5, %p1514_p2 }
 0x19b   :  { %1524 = shalt.err (!%p1521_p6)
}
 0x19c   :  { %s1525_s14 = scalar_lea.hbm %s1659_s2, 256 }
 0x19d   :  { %p1526_p7 = scmp.ne.s32.totalorder %s1659_s2, %s1525_s14  ;;  %p1529_p8 = scmp.lt.u32.totalorder %s1525_s14, %s1659_s2 }
 0x19f   :  { %p1531_p9 = pnand %p1529_p8, %p1526_p7 }
 0x1a1   :  { %1534 = shalt.err (!%p1531_p9)
}
 0x1a2   :  { %s1550_s19 = smov 256  }
 0x1a3   :  { %1196 = dma.vmem_to_hbm [thread:$0]  %s1191_s9, 256, %s1659_s2, [#allocation4], %s1550_s19, %s1550_s19, %s1542_s20  }
 0x1a4   :  { %1539 = dma.done.wait [#allocation4], 2048  }
 0x1a5   :  { %1540 = vsyncadd [#allocation4], 4294965248 }
 0x1a6   :  { %1200 = vsyncpa [#allocation3], 1 }
 0x1a7   :  { %1201 = vsyncpa [#allocation6], 1 }
 0x1a8   :  { %1202 = vsyncpa [#allocation4], 1 }

</bundles_post_ra>
